<compile_context>
chip_gen: v7x
topology: tpu7x:2x2x1
jax: 0.10.0
libtpu: 0.0.40
codegen_flags: <defaults>
</compile_context>

<pallas_src>
import functools

import jax
import jax.numpy as jnp
from jax import lax
from jax.experimental import pallas as pl
from jax.experimental.pallas import tpu as pltpu

# Finite stand-in for -inf so the online softmax never computes inf - inf.
# (Fully-masked rows become uniform instead of NaN; PyTorch yields NaN there.)
_MASK_VALUE = -1e30


# ---------------------------------------------------------------------------
# Hardware-aware helpers
# ---------------------------------------------------------------------------
def _vmem_budget():
    """Per-core VMEM budget with ~25% headroom for Mosaic internal scratch."""
    cap = 64 * 1024 * 1024
    try:
        info = pltpu.get_tpu_info()
        cap = int(getattr(info, "vmem_capacity_bytes", cap)) or cap
    except Exception:
        pass
    return (cap * 3) // 4          # ~48 MiB on v7x, ~96 MiB on v5e/v6e


def _pick_block(dim, target, align):
    """Largest multiple of `align` <= target that evenly divides `dim`,
    falling back to the full extent (always a legal block shape)."""
    if dim <= target:
        return dim
    b = (target // align) * align
    while b >= align:
        if dim % b == 0:
            return b
        b -= align
    # TODO(synk): pad + mask ragged Lq/Lk instead of falling back to full extent.
    return dim


def _q_align(Lq):
    return 128 if (Lq >= 128 and Lq % 128 == 0) else 8


def _pick_q_block(Lq, block_q):
    """MXU-aligned q block, capped so >=2 blocks exist for v7x megacore."""
    align = _q_align(Lq)
    target = block_q
    if Lq >= 2 * align:
        target = min(target, max(align, Lq // 2))
    return _pick_block(Lq, target, align)


def _full_path_bq(Lq, Lk, D, Dv, itemsize, has_mask, block_q, budget, kv_bufs):
    """Lk-aware bq for the with-attention path so the footprint fits VMEM."""
    align = _q_align(Lq)
    fixed = kv_bufs * Lk * (D + Dv) * itemsize              # resident K + V
    per_row = (2 * D * itemsize                             # q (double buffered)
               + 2 * Dv * itemsize                          # ctx out
               + 2 * Lk * itemsize                          # attn out
               + 3 * Lk * 4)                                # in-kernel f32 s/e/attn
    if has_mask:
        per_row += 2 * Lk                                   # int8 mask
    avail = budget - fixed
    cap = max(align, (avail // per_row) // align * align) if avail > 0 else align
    target = min(block_q, cap)
    if Lq >= 2 * align:
        target = min(target, max(align, Lq // 2))            # megacore balance
    return _pick_block(Lq, target, align)


# ---------------------------------------------------------------------------
# Kernel 1: context + full attention matrix (Lq tiled / parallel, Lk un-tiled).
# ---------------------------------------------------------------------------
def _sdpa_full_kernel(*refs, scale, has_mask, qk_dtype):
    if has_mask:
        q_ref, k_ref, v_ref, mask_ref, ctx_ref, attn_ref = refs
    else:
        q_ref, k_ref, v_ref, ctx_ref, attn_ref = refs
        mask_ref = None

    q = q_ref[...]
    if scale is not None:
        q = q * jnp.asarray(scale, q.dtype)   # fold scale into q: O(Lq*D)
    k = k_ref[...]
    if qk_dtype is not None:                  # opt-in bf16 MXU fast path
        q = q.astype(qk_dtype)
        k = k.astype(qk_dtype)

    # scores[i, j] = sum_d q[i, d] * k[j, d]  (contract on D, no k.T relayout)
    s = lax.dot_general(q, k,
                        dimension_numbers=(((1,), (1,)), ((), ())),
                        preferred_element_type=jnp.float32)
    if has_mask:
        s = jnp.where(mask_ref[...] != 0, jnp.float32(_MASK_VALUE), s)

    m = jnp.max(s, axis=1, keepdims=True)
    e = jnp.exp(s - m)
    l = jnp.sum(e, axis=1, keepdims=True)
    attn = e / l                              # exact: probabilities are returned

    # TODO(synk): dropout with p>0 not implemented (module default p=0.0 -> identity).
    ctx = lax.dot_general(attn.astype(v_ref.dtype), v_ref[...],
                          dimension_numbers=(((1,), (0,)), ((), ())),
                          preferred_element_type=jnp.float32)

    attn_ref[...] = attn.astype(attn_ref.dtype)
    ctx_ref[...] = ctx.astype(ctx_ref.dtype)


# ---------------------------------------------------------------------------
# Kernel 2: flash-style online softmax, context only
#           (Lq "parallel" x Lk "arbitrary" reduction axis).
# ---------------------------------------------------------------------------
def _flash_kernel(*refs, scale, has_mask, qk_dtype):
    if has_mask:
        q_ref, k_ref, v_ref, mask_ref, o_ref, m_sc, l_sc, acc_sc = refs
    else:
        q_ref, k_ref, v_ref, o_ref, m_sc, l_sc, acc_sc = refs
        mask_ref = None

    kv = pl.program_id(1)

    @pl.when(kv == 0)
    def _init():
        m_sc[...] = jnp.full_like(m_sc, -jnp.inf)
        l_sc[...] = jnp.zeros_like(l_sc)
        acc_sc[...] = jnp.zeros_like(acc_sc)

    q = q_ref[...]
    if scale is not None:
        q = q * jnp.asarray(scale, q.dtype)
    k = k_ref[...]
    if qk_dtype is not None:
        q = q.astype(qk_dtype)
        k = k.astype(qk_dtype)

    s = lax.dot_general(q, k,
                        dimension_numbers=(((1,), (1,)), ((), ())),
                        preferred_element_type=jnp.float32)
    if has_mask:
        # TODO(synk): for structured (causal-style) masks, generate in-kernel via
        # broadcasted_iota and skip fully-masked kv blocks with pl.when.
        s = jnp.where(mask_ref[...] != 0, jnp.float32(_MASK_VALUE), s)

    m_prev = m_sc[...]
    m_new = jnp.maximum(m_prev, jnp.max(s, axis=1, keepdims=True))
    alpha = jnp.exp(m_prev - m_new)
    p = jnp.exp(s - m_new)

    l_sc[...] = alpha * l_sc[...] + jnp.sum(p, axis=1, keepdims=True)
    acc_sc[...] = alpha * acc_sc[...] + lax.dot_general(
        p.astype(v_ref.dtype), v_ref[...],
        dimension_numbers=(((1,), (0,)), ((), ())),
        preferred_element_type=jnp.float32)
    m_sc[...] = m_new

    @pl.when(kv == pl.num_programs(1) - 1)
    def _finalize():
        inv_l = pl.reciprocal(l_sc[...], approx=True)  # EUP, applied once
        o_ref[...] = (acc_sc[...] * inv_l).astype(o_ref.dtype)


# ---------------------------------------------------------------------------
# Wrappers
# ---------------------------------------------------------------------------
def _sdpa_with_attention(q, k, v, scale, mask_i8, block_q, budget, qk_dtype):
    Lq, D = q.shape
    Lk, Dv = v.shape
    has_mask = mask_i8 is not None
    itemsize = jnp.dtype(q.dtype).itemsize

    kernel = functools.partial(_sdpa_full_kernel, scale=scale,
                               has_mask=has_mask, qk_dtype=qk_dtype)

    def build(single_buffer_kv):
        kv_bufs = 1 if single_buffer_kv else 2
        bq = _full_path_bq(Lq, Lk, D, Dv, itemsize, has_mask,
                           block_q, budget, kv_bufs)
        kv_kwargs = ({"pipeline_mode": pl.Buffered(1)}
                     if single_buffer_kv else {})

        in_specs = [
            pl.BlockSpec((bq, D), lambda i: (i, 0)),
            # K/V never change across the q grid -> single buffer them.
            pl.BlockSpec((Lk, D), lambda i: (0, 0), **kv_kwargs),
            pl.BlockSpec((Lk, Dv), lambda i: (0, 0), **kv_kwargs),
        ]
        inputs = [q, k, v]
        if has_mask:
            in_specs.append(pl.BlockSpec((bq, Lk), lambda i: (i, 0)))
            inputs.append(mask_i8)

        out_shapes = (
            jax.ShapeDtypeStruct((Lq, Dv), q.dtype),   # context
            jax.ShapeDtypeStruct((Lq, Lk), q.dtype),   # attention probabilities
        )
        out_specs = [
            pl.BlockSpec((bq, Dv), lambda i: (i, 0)),
            pl.BlockSpec((bq, Lk), lambda i: (i, 0)),
        ]

        call = pl.pallas_call(
            kernel,
            out_shape=out_shapes,
            grid_spec=pltpu.PrefetchScalarGridSpec(
                num_scalar_prefetch=0,
                grid=(Lq // bq,),
                in_specs=in_specs,
                out_specs=out_specs,
            ),
            compiler_params=pltpu.CompilerParams(
                dimension_semantics=("parallel",),
                vmem_limit_bytes=budget,
            ),
        )
        return call, inputs

    try:
        call, inputs = build(True)
        return call(*inputs)
    except Exception:
        call, inputs = build(False)   # fallback: no pipeline_mode override
        return call(*inputs)


def _sdpa_context_only(q, k, v, scale, mask_i8, block_q, block_k, budget,
                       qk_dtype):
    Lq, D = q.shape
    Lk, Dv = v.shape
    has_mask = mask_i8 is not None

    bq = _pick_q_block(Lq, block_q)
    bk = _pick_block(Lk, block_k, 128 if (Lk >= 128 and Lk % 128 == 0) else 8)
    # Deeper K/V pipelining only when VMEM is plentiful (v5e/v6e); keep the
    # default depth 2 on v7x's 64 MiB VMEM.
    deep_buffer = budget >= 80 * 1024 * 1024

    kernel = functools.partial(_flash_kernel, scale=scale,
                               has_mask=has_mask, qk_dtype=qk_dtype)

    def build(use_pipeline_mode):
        kv_kwargs = ({"pipeline_mode": pl.Buffered(3)}
                     if (use_pipeline_mode and deep_buffer) else {})
        in_specs = [
            pl.BlockSpec((bq, D), lambda i, j: (i, 0)),
            pl.BlockSpec((bk, D), lambda i, j: (j, 0), **kv_kwargs),
            pl.BlockSpec((bk, Dv), lambda i, j: (j, 0), **kv_kwargs),
        ]
        inputs = [q, k, v]
        if has_mask:
            in_specs.append(pl.BlockSpec((bq, bk), lambda i, j: (i, j)))
            inputs.append(mask_i8)

        # TODO(synk): fold a head/batch dim into the last axis so the output /
        # accumulator last dim is >=128 (lane-dense stores) when Dv < 128.
        call = pl.pallas_call(
            kernel,
            out_shape=jax.ShapeDtypeStruct((Lq, Dv), q.dtype),
            grid_spec=pltpu.PrefetchScalarGridSpec(
                num_scalar_prefetch=0,
                grid=(Lq // bq, Lk // bk),
                in_specs=in_specs,
                out_specs=pl.BlockSpec((bq, Dv), lambda i, j: (i, 0)),
                scratch_shapes=[
                    pltpu.VMEM((bq, 1), jnp.float32),    # running max m
                    pltpu.VMEM((bq, 1), jnp.float32),    # running denom l
                    pltpu.VMEM((bq, Dv), jnp.float32),   # running context acc
                ],
            ),
            compiler_params=pltpu.CompilerParams(
                dimension_semantics=("parallel", "arbitrary"),
                vmem_limit_bytes=budget,
            ),
        )
        return call, inputs

    try:
        call, inputs = build(True)
        return call(*inputs)
    except Exception:
        call, inputs = build(False)
        return call(*inputs)


def scaled_dot_product_attention(q, k, v, scale=None, attn_mask=None,
                                 return_attention=True,
                                 block_q=512, block_k=1024,
                                 use_bf16_matmul=False):
    """Pallas port of ScaledDotProductAttention.forward.

    Returns (context, attention) like the PyTorch module.  Callers that do not
    need the Lq x Lk probability matrix can pass return_attention=False to use
    the tiled online-softmax kernel (context only; attention returned as None).
    use_bf16_matmul=True opts into the bf16 QK^T MXU fast path (v6e/v7x).
    """
    Lq, D = q.shape
    Lk, Dk = k.shape
    assert D == Dk, "q and k must share the feature dimension"
    assert v.shape[0] == Lk, "k and v must share the key dimension"
    if not scale:  # match PyTorch's `if scale:` truthiness
        scale = None

    # Pass the mask as 1-byte int8; masking happens in-kernel (no f32 bias in HBM).
    mask_i8 = None if attn_mask is None else attn_mask.astype(jnp.int8)
    budget = _vmem_budget()
    qk_dtype = (jnp.bfloat16
                if (use_bf16_matmul and q.dtype == jnp.float32) else None)

    if return_attention:
        return _sdpa_with_attention(q, k, v, scale, mask_i8, block_q, budget,
                                    qk_dtype)
    ctx = _sdpa_context_only(q, k, v, scale, mask_i8, block_q, block_k, budget,
                             qk_dtype)
    return ctx, None


# ---------------------------------------------------------------------------
# Reference + demo
# ---------------------------------------------------------------------------
def _reference(q, k, v, scale=None, attn_mask=None):
    s = jnp.dot(q.astype(jnp.float32), k.astype(jnp.float32).T)
    if scale:
        s = s * scale
    if attn_mask is not None:
        s = jnp.where(attn_mask, _MASK_VALUE, s)
    attn = jax.nn.softmax(s, axis=1)
    ctx = jnp.dot(attn, v.astype(jnp.float32))
    return ctx, attn


if __name__ == "__main__":
    # --- Case 1: tiny shapes implied by the module (single grid step). -----
    key = jax.random.PRNGKey(0)
    kq, kk, kv_ = jax.random.split(key, 3)
    Lq, Lk, D, Dv = 8, 16, 32, 32
    q = jax.random.normal(kq, (Lq, D), dtype=jnp.float32)
    k = jax.random.normal(kk, (Lk, D), dtype=jnp.float32)
    v = jax.random.normal(kv_, (Lk, Dv), dtype=jnp.float32)
    scale = 1.0 / (D ** 0.5)

    ctx, attn = scaled_dot_product_attention(q, k, v, scale=scale)
    jax.block_until_ready((ctx, attn))
    ctx_ref, attn_ref = _reference(q, k, v, scale=scale)
    assert jnp.allclose(ctx, ctx_ref, atol=3e-3, rtol=3e-3)
    assert jnp.allclose(attn, attn_ref, atol=3e-3, rtol=3e-3)

    # --- Case 2: larger shapes exercising the tiled grids + mask. ----------
    key2 = jax.random.PRNGKey(1)
    kq2, kk2, kv2 = jax.random.split(key2, 3)
    Lq2, Lk2, D2, Dv2 = 512, 1024, 64, 64
    q2 = jax.random.normal(kq2, (Lq2, D2), dtype=jnp.float32)
    k2 = jax.random.normal(kk2, (Lk2, D2), dtype=jnp.float32)
    v2 = jax.random.normal(kv2, (Lk2, Dv2), dtype=jnp.float32)
    scale2 = 1.0 / (D2 ** 0.5)
    # "causal-ish" boolean mask: query i may attend keys j <= 2*i + 1 (no empty rows)
    mask2 = jnp.arange(Lk2)[None, :] > (2 * jnp.arange(Lq2)[:, None] + 1)

    ctx2, attn2 = scaled_dot_product_attention(q2, k2, v2, scale=scale2,
                                               attn_mask=mask2)
    jax.block_until_ready((ctx2, attn2))
    ctx2_ref, attn2_ref = _reference(q2, k2, v2, scale=scale2, attn_mask=mask2)
    assert jnp.allclose(ctx2, ctx2_ref, atol=3e-3, rtol=3e-3)
    assert jnp.allclose(attn2, attn2_ref, atol=3e-3, rtol=3e-3)

    # Context-only flash path (online softmax over kv tiles, no attn writeback).
    ctx3, attn3 = scaled_dot_product_attention(q2, k2, v2, scale=scale2,
                                               attn_mask=mask2,
                                               return_attention=False)
    jax.block_until_ready(ctx3)
    assert attn3 is None
    assert jnp.allclose(ctx3, ctx2_ref, atol=3e-3, rtol=3e-3)

    print("KERNEL_OK")
</pallas_src>

<mosaic_0001>
module attributes {stable_mosaic.version = 11 : i64} {
  func.func @_sdpa_full_kernel(%arg0: i32, %arg1: memref<8x32xf32, #tpu.memory_space<vmem>>, %arg2: memref<16x32xf32, #tpu.memory_space<vmem>>, %arg3: memref<16x32xf32, #tpu.memory_space<vmem>>, %arg4: memref<8x32xf32, #tpu.memory_space<vmem>>, %arg5: memref<8x16xf32, #tpu.memory_space<vmem>>) attributes {dimension_semantics = [#tpu.dimension_semantics<parallel>], iteration_bounds = array<i64: 1>, scalar_prefetch = 0 : i64, scratch_operands = 0 : i64, tpu.core_type = #tpu.core_type<tc>, window_params = [{transform_indices = @transform_0, window_bounds = array<i64: 8, 32>}, {pipeline_mode = #tpu.pipeline_mode<synchronous>, transform_indices = @transform_1, window_bounds = array<i64: 16, 32>}, {pipeline_mode = #tpu.pipeline_mode<synchronous>, transform_indices = @transform_2, window_bounds = array<i64: 16, 32>}, {transform_indices = @transform_3, window_bounds = array<i64: 8, 32>}, {transform_indices = @transform_4, window_bounds = array<i64: 8, 16>}]} {
    %c0 = arith.constant 0 : index
    %c0_0 = arith.constant 0 : index
    %0 = vector.load %arg1[%c0, %c0_0] : memref<8x32xf32, #tpu.memory_space<vmem>>, vector<8x32xf32>
    %cst = arith.constant 0.176776692 : f32
    %1 = vector.broadcast %cst : f32 to vector<8x32xf32>
    %2 = arith.mulf %0, %1 : vector<8x32xf32>
    %c0_1 = arith.constant 0 : index
    %c0_2 = arith.constant 0 : index
    %3 = vector.load %arg2[%c0_1, %c0_2] : memref<16x32xf32, #tpu.memory_space<vmem>>, vector<16x32xf32>
    %cst_3 = arith.constant dense<0.000000e+00> : vector<8x16xf32>
    %4 = tpu.matmul %2, %3, %cst_3 {dimension_numbers = #tpu.dot_dimension_numbers<[1], [1], [0], [0], [0, 0, 1, 0], [], []>} : vector<8x32xf32>, vector<16x32xf32>, vector<8x16xf32> -> vector<8x16xf32>
    %cst_4 = arith.constant dense<0xFF800000> : vector<8xf32>
    %5 = vector.multi_reduction <maximumf>, %4, %cst_4 [1] : vector<8x16xf32> to vector<8xf32>
    %6 = vector.shape_cast %5 : vector<8xf32> to vector<8x1xf32>
    %7 = vector.broadcast %6 : vector<8x1xf32> to vector<8x16xf32>
    %8 = arith.subf %4, %7 : vector<8x16xf32>
    %9 = math.exp %8 : vector<8x16xf32>
    %cst_5 = arith.constant dense<0.000000e+00> : vector<8xf32>
    %10 = vector.multi_reduction <add>, %9, %cst_5 [1] : vector<8x16xf32> to vector<8xf32>
    %11 = vector.shape_cast %10 : vector<8xf32> to vector<8x1xf32>
    %12 = vector.broadcast %11 : vector<8x1xf32> to vector<8x16xf32>
    %13 = arith.divf %9, %12 : vector<8x16xf32>
    %c0_6 = arith.constant 0 : index
    %c0_7 = arith.constant 0 : index
    %14 = vector.load %arg3[%c0_6, %c0_7] : memref<16x32xf32, #tpu.memory_space<vmem>>, vector<16x32xf32>
    %cst_8 = arith.constant dense<0.000000e+00> : vector<8x32xf32>
    %15 = tpu.matmul %13, %14, %cst_8 {dimension_numbers = #tpu.dot_dimension_numbers<[1], [0], [0], [1], [0, 0, 1, 1], [], []>} : vector<8x16xf32>, vector<16x32xf32>, vector<8x32xf32> -> vector<8x32xf32>
    %c0_9 = arith.constant 0 : index
    %c0_10 = arith.constant 0 : index
    %16 = vector.load %arg5[%c0_9, %c0_10] : memref<8x16xf32, #tpu.memory_space<vmem>>, vector<8x16xf32>
    tpu.vector_store %arg5[%c0_9, %c0_10], %13 {strides = array<i32>} : memref<8x16xf32, #tpu.memory_space<vmem>>, vector<8x16xf32>,
    %c0_11 = arith.constant 0 : index
    %c0_12 = arith.constant 0 : index
    %17 = vector.load %arg4[%c0_11, %c0_12] : memref<8x32xf32, #tpu.memory_space<vmem>>, vector<8x32xf32>
    tpu.vector_store %arg4[%c0_11, %c0_12], %15 {strides = array<i32>} : memref<8x32xf32, #tpu.memory_space<vmem>>, vector<8x32xf32>,
    return
  }
  func.func @transform_0(%arg0: i32) -> (i32, i32) {
    %c0_i32 = arith.constant 0 : i32
    %c0_i32_0 = arith.constant 0 : i32
    return %arg0, %c0_i32 : i32, i32
  }
  func.func @transform_1(%arg0: i32) -> (i32, i32) {
    %c0_i32 = arith.constant 0 : i32
    %c0_i32_0 = arith.constant 0 : i32
    %c0_i32_1 = arith.constant 0 : i32
    return %c0_i32, %c0_i32_0 : i32, i32
  }
  func.func @transform_2(%arg0: i32) -> (i32, i32) {
    %c0_i32 = arith.constant 0 : i32
    %c0_i32_0 = arith.constant 0 : i32
    %c0_i32_1 = arith.constant 0 : i32
    return %c0_i32, %c0_i32_0 : i32, i32
  }
  func.func @transform_3(%arg0: i32) -> (i32, i32) {
    %c0_i32 = arith.constant 0 : i32
    %c0_i32_0 = arith.constant 0 : i32
    return %arg0, %c0_i32 : i32, i32
  }
  func.func @transform_4(%arg0: i32) -> (i32, i32) {
    %c0_i32 = arith.constant 0 : i32
    %c0_i32_0 = arith.constant 0 : i32
    return %arg0, %c0_i32 : i32, i32
  }
}

module attributes {stable_mosaic.version = 11 : i64} {
  func.func @_sdpa_full_kernel(%arg0: i32, %arg1: memref<8x32xf32, #tpu.memory_space<vmem>>, %arg2: memref<16x32xf32, #tpu.memory_space<vmem>>, %arg3: memref<16x32xf32, #tpu.memory_space<vmem>>, %arg4: memref<8x32xf32, #tpu.memory_space<vmem>>, %arg5: memref<8x16xf32, #tpu.memory_space<vmem>>) attributes {dimension_semantics = [#tpu.dimension_semantics<parallel>], iteration_bounds = array<i64: 1>, scalar_prefetch = 0 : i64, scratch_operands = 0 : i64, tpu.core_type = #tpu.core_type<tc>, window_params = [{transform_indices = @transform_0, window_bounds = array<i64: 8, 32>}, {pipeline_mode = #tpu.pipeline_mode<synchronous>, transform_indices = @transform_1, window_bounds = array<i64: 16, 32>}, {pipeline_mode = #tpu.pipeline_mode<synchronous>, transform_indices = @transform_2, window_bounds = array<i64: 16, 32>}, {transform_indices = @transform_3, window_bounds = array<i64: 8, 32>}, {transform_indices = @transform_4, window_bounds = array<i64: 8, 16>}]} {
    %c0 = arith.constant 0 : index
    %c0_0 = arith.constant 0 : index
    %0 = vector.load %arg1[%c0, %c0_0] : memref<8x32xf32, #tpu.memory_space<vmem>>, vector<8x32xf32>
    %cst = arith.constant 0.176776692 : f32
    %1 = vector.broadcast %cst : f32 to vector<8x32xf32>
    %2 = arith.mulf %0, %1 : vector<8x32xf32>
    %c0_1 = arith.constant 0 : index
    %c0_2 = arith.constant 0 : index
    %3 = vector.load %arg2[%c0_1, %c0_2] : memref<16x32xf32, #tpu.memory_space<vmem>>, vector<16x32xf32>
    %cst_3 = arith.constant dense<0.000000e+00> : vector<8x16xf32>
    %4 = tpu.matmul %2, %3, %cst_3 {dimension_numbers = #tpu.dot_dimension_numbers<[1], [1], [0], [0], [0, 0, 1, 0], [], []>} : vector<8x32xf32>, vector<16x32xf32>, vector<8x16xf32> -> vector<8x16xf32>
    %cst_4 = arith.constant dense<0xFF800000> : vector<8xf32>
    %5 = vector.multi_reduction <maximumf>, %4, %cst_4 [1] : vector<8x16xf32> to vector<8xf32>
    %6 = vector.shape_cast %5 : vector<8xf32> to vector<8x1xf32>
    %7 = vector.broadcast %6 : vector<8x1xf32> to vector<8x16xf32>
    %8 = arith.subf %4, %7 : vector<8x16xf32>
    %9 = math.exp %8 : vector<8x16xf32>
    %cst_5 = arith.constant dense<0.000000e+00> : vector<8xf32>
    %10 = vector.multi_reduction <add>, %9, %cst_5 [1] : vector<8x16xf32> to vector<8xf32>
    %11 = vector.shape_cast %10 : vector<8xf32> to vector<8x1xf32>
    %12 = vector.broadcast %11 : vector<8x1xf32> to vector<8x16xf32>
    %13 = arith.divf %9, %12 : vector<8x16xf32>
    %c0_6 = arith.constant 0 : index
    %c0_7 = arith.constant 0 : index
    %14 = vector.load %arg3[%c0_6, %c0_7] : memref<16x32xf32, #tpu.memory_space<vmem>>, vector<16x32xf32>
    %cst_8 = arith.constant dense<0.000000e+00> : vector<8x32xf32>
    %15 = tpu.matmul %13, %14, %cst_8 {dimension_numbers = #tpu.dot_dimension_numbers<[1], [0], [0], [1], [0, 0, 1, 1], [], []>} : vector<8x16xf32>, vector<16x32xf32>, vector<8x32xf32> -> vector<8x32xf32>
    %c0_9 = arith.constant 0 : index
    %c0_10 = arith.constant 0 : index
    %16 = vector.load %arg5[%c0_9, %c0_10] : memref<8x16xf32, #tpu.memory_space<vmem>>, vector<8x16xf32>
    tpu.vector_store %arg5[%c0_9, %c0_10], %13 {strides = array<i32>} : memref<8x16xf32, #tpu.memory_space<vmem>>, vector<8x16xf32>,
    %c0_11 = arith.constant 0 : index
    %c0_12 = arith.constant 0 : index
    %17 = vector.load %arg4[%c0_11, %c0_12] : memref<8x32xf32, #tpu.memory_space<vmem>>, vector<8x32xf32>
    tpu.vector_store %arg4[%c0_11, %c0_12], %15 {strides = array<i32>} : memref<8x32xf32, #tpu.memory_space<vmem>>, vector<8x32xf32>,
    return
  }
  func.func @transform_0(%arg0: i32) -> (i32, i32) {
    %c0_i32 = arith.constant 0 : i32
    %c0_i32_0 = arith.constant 0 : i32
    return %arg0, %c0_i32 : i32, i32
  }
  func.func @transform_1(%arg0: i32) -> (i32, i32) {
    %c0_i32 = arith.constant 0 : i32
    %c0_i32_0 = arith.constant 0 : i32
    %c0_i32_1 = arith.constant 0 : i32
    return %c0_i32, %c0_i32_0 : i32, i32
  }
  func.func @transform_2(%arg0: i32) -> (i32, i32) {
    %c0_i32 = arith.constant 0 : i32
    %c0_i32_0 = arith.constant 0 : i32
    %c0_i32_1 = arith.constant 0 : i32
    return %c0_i32, %c0_i32_0 : i32, i32
  }
  func.func @transform_3(%arg0: i32) -> (i32, i32) {
    %c0_i32 = arith.constant 0 : i32
    %c0_i32_0 = arith.constant 0 : i32
    return %arg0, %c0_i32 : i32, i32
  }
  func.func @transform_4(%arg0: i32) -> (i32, i32) {
    %c0_i32 = arith.constant 0 : i32
    %c0_i32_0 = arith.constant 0 : i32
    return %arg0, %c0_i32 : i32, i32
  }
}

</mosaic_0001>

<bundles_post_ra>
// kernel: tpu_custom_call.1
= control target key start
LH: loop header
LB: loop body
LE: loop exit
PB: predicated region body
PF: predicated region fallthrough
CT: control target
= control target key end

     0   :  { %10 = vsyncpa [#allocation3], 0  ;;  %s532_s0 = inlined_call_operand.hbm [shape: f32[8,32], index: 0, kind: input, shape index: {}]   ;;  %s533_s1 = inlined_call_operand.hbm [shape: f32[16,32], index: 1, kind: input, shape index: {}]   ;;  %s534_s2 = inlined_call_operand.hbm [shape: f32[16,32], index: 2, kind: input, shape index: {}]   ;;  %s535_s3 = inlined_call_operand.hbm [shape: f32[8,32], index: 3, kind: output, shape index: {0}]   ;;  %s536_s4 = inlined_call_operand.hbm [shape: f32[8,16], index: 4, kind: output, shape index: {1}]  }
   0x1   :  { %11 = vsyncpa [#allocation6], 0 }
   0x2   :  { %12 = vsyncpa [#allocation4], 0 }
   0x3   :  { %13 = vsyncpa [#allocation10], 0  ;;  %s423_s15 = smov [#allocation5]   ;;  %s305_s19 = scalar_lea.hbm %s533_s1, 256 }
   0x4   :  { %s29_s16 = sshll.u32 %s423_s15, 4  ;;  %p306_p0 = scmp.ne.s32.totalorder %s533_s1, %s305_s19  ;;  %s30_s16 = int_to_ptr.vmem [resolvable:$true] %s29_s16 }
   0x5   :  { %p309_p1 = scmp.lt.u32.totalorder %s305_s19, %s533_s1 }
   0x7   :  { %p311_p2 = pnand %p309_p1, %p306_p0 }
   0x9   :  { %314 = shalt.err (!%p311_p2)
}
   0xa   :  { %s315_s24 = scalar_lea.vmem %s30_s16, 256  ;;  %p320_p4 = scmp.lt.s32.totalorder %s30_s16, %s30_s16 }
   0xb   :  { %p316_p3 = scmp.ne.s32.totalorder %s30_s16, %s315_s24  ;;  %p321_p5 = scmp.lt.s32.totalorder %s315_s24, %s315_s24 }
   0xd   :  { %p322_p6 = por %p321_p5, %p320_p4 }
   0xf   :  { %p323_p7 = pnand %p322_p6, %p316_p3 }
  0x11   :  { %326 = shalt.err (!%p323_p7)
}
  0x12   :  { %s424_s25 = smov 128   ;;  %s425_s26 = smov 8  }
  0x13   :  { %35 = dma.hbm_to_vmem [thread:$0]  %s533_s1, 256, %s30_s16, [#allocation6], %s424_s25, %s424_s25, %s425_s26  }
  0x14   :  { %s426_s29 = smov [#allocation2]   ;;  %s427_s5 = smov [#allocation7]  }
  0x15   :  { %s20_s30 = sshll.u32 %s426_s29, 4  ;;  %s41_s6 = sshll.u32 %s427_s5, 4  ;;  %s21_s30 = int_to_ptr.vmem [resolvable:$true] %s20_s30  ;;  %s42_s6 = int_to_ptr.vmem [resolvable:$true] %s41_s6 }
  0x16   :  { %s327_s9 = scalar_lea.hbm %s532_s0, 128 }
  0x17   :  { %p328_p8 = scmp.ne.s32.totalorder %s532_s0, %s327_s9  ;;  %p331_p9 = scmp.lt.u32.totalorder %s327_s9, %s532_s0 }
  0x19   :  { %p333_p10 = pnand %p331_p9, %p328_p8 }
  0x1b   :  { %336 = shalt.err (!%p333_p10)
}
  0x1c   :  { %s337_s1 = scalar_lea.vmem %s21_s30, 128  ;;  %p342_p12 = scmp.lt.s32.totalorder %s21_s30, %s21_s30 }
  0x1d   :  { %p338_p11 = scmp.ne.s32.totalorder %s21_s30, %s337_s1  ;;  %p343_p13 = scmp.lt.s32.totalorder %s337_s1, %s337_s1 }
  0x1f   :  { %p344_p0 = por %p343_p13, %p342_p12 }
  0x21   :  { %p345_p1 = pnand %p344_p0, %p338_p11 }
  0x23   :  { %348 = shalt.err (!%p345_p1)
}
  0x24   :  { %23 = dma.hbm_to_vmem [thread:$0]  %s532_s0, 128, %s21_s30, [#allocation3]  }
  0x25   :  { %s349_s18 = scalar_lea.hbm %s534_s2, 256 }
  0x26   :  { %p350_p2 = scmp.ne.s32.totalorder %s534_s2, %s349_s18  ;;  %p353_p3 = scmp.lt.u32.totalorder %s349_s18, %s534_s2 }
  0x28   :  { %p355_p4 = pnand %p353_p3, %p350_p2 }
  0x2a   :  { %358 = shalt.err (!%p355_p4)
}
  0x2b   :  { %s359_s23 = scalar_lea.vmem %s42_s6, 256  ;;  %p364_p6 = scmp.lt.s32.totalorder %s42_s6, %s42_s6 }
  0x2c   :  { %p360_p5 = scmp.ne.s32.totalorder %s42_s6, %s359_s23  ;;  %p365_p7 = scmp.lt.s32.totalorder %s359_s23, %s359_s23 }
  0x2e   :  { %p366_p8 = por %p365_p7, %p364_p6 }
  0x30   :  { %p367_p9 = pnand %p366_p8, %p360_p5 }
  0x32   :  { %370 = shalt.err (!%p367_p9)
}
  0x33   :  { %47 = dma.hbm_to_vmem [thread:$0]  %s534_s2, 256, %s42_s6, [#allocation6], %s424_s25, %s424_s25, %s425_s26  }
  0x34   :  { %415 = dma.done.wait [#allocation3], 128  }
  0x35   :  { %416 = vsyncadd [#allocation3], 4294967168 }
  0x36   :  { %417 = dma.done.wait [#allocation6], 512  }
  0x37   :  { %418 = vsyncadd [#allocation6], 4294966784  ;;  %v428_v0 = vmov 0.0|0.0   ;;  %vm429_vm0 = vmmov 0   ;;  %v430_v1 = vmov 0.0   ;;  %vm61_vm1 = vcmask 261120  }
  0x38   :  { %284 = vmatprep.subr.bf16.mxu0 %v428_v0  ;;  %274 = vmatprep.mubr.msk.f32.mxu0 %vm429_vm0, %v430_v1  ;;  %v59_v2 = vld [vmem:[#allocation5] sm:$0xff]  ;;  %v60_v3 = vld [vmem:[#allocation5 + $0x8] sm:$0xff]  ;;  %vm286_vm2 = vmpackc.low %vm61_vm1, %vm61_vm1  ;;  %vm141_vm3 = vcmask 130048   ;;  %s431_s2 = smov [#allocation9]  }
  0x39   :  { %288 = vmatprep.subr.bf16.mxu1 %v428_v0  ;;  %281 = vmatprep.mubr.msk.f32.mxu1 %vm429_vm0, %v430_v1  ;;  %v285_v4 = vpack.c.bf16 %v60_v3, %v59_v2  ;;  %v57_v5 = vld [vmem:[#allocation2] sm:$0xff]  ;;  %v153_v15 = vld [vmem:[#allocation7] sm:$0xff]  ;;  %s246_s25 = sshll.u32 %s431_s2, 4  ;;  %s247_s25 = int_to_ptr.vmem [resolvable:$true] %s246_s25 }
  0x3a   :  { %v58_v6 = vmul.f32 0.17677669, %v57_v5  ;;  %v154_v16 = vld [vmem:[#allocation7 + $0x8] sm:$0xff]  ;;  %s371_s26 = scalar_lea.vmem %s247_s25, 128  ;;  %p376_p11 = scmp.lt.s32.totalorder %s247_s25, %s247_s25 }
  0x3b   :  { %287 = vmatpush3.bf16.xpose.msk.msra.mxu0 %vm286_vm2, %v285_v4  ;;  %v289_v17 = vpack.c.bf16 %v154_v16, %v153_v15  ;;  %p372_p10 = scmp.ne.s32.totalorder %s247_s25, %s371_s26  ;;  %p377_p12 = scmp.lt.s32.totalorder %s371_s26, %s371_s26 }
  0x3d   :  { %290 = vmatpush3.bf16.msra.mxu1 %v289_v17  ;;  %p378_p13 = por %p377_p12, %p376_p11 }
  0x3f   :  { %p379_p0 = pnand %p378_p13, %p372_p10 }
  0x42   :  { %275 = vmatmul.mubr.msk.f32.vlgmr.msra.gmra.mrb[0].mxu0 %vm61_vm1, %v58_v6 }
 0x115   :  { %v137_v7 = vpop.f32.mrb[0].mxu0 }
 0x116   :  { %v276_v8 = vpop.f32.mrb[1].mxu0  ;;  %v142_v9 = vsel %vm141_vm3, %v137_v7, -inf }
 0x117   :  { %143 = vmax.xlane.f32.xlu0 %v142_v9 }
 0x1a4   :  { %v144_v10 = vpop.xlane.xlu0 %143 }
 0x1a5   :  { %v145_v11 = vsub.f32 %v137_v7, %v144_v10 }
 0x1a7   :  { %v146_v12 = vmul.f32 1.442695, %v145_v11 }
 0x1a9   :  { %301 = vpow2.f32 %v146_v12 }
 0x1b3   :  { %v302_v13 = vpop.eup %301 }
 0x1b4   :  { %v148_v14 = vsel %vm141_vm3, %v302_v13, 0.0 }
 0x1b5   :  { %149 = vadd.xlane.f32.xlu0 %v148_v14 }
 0x242   :  { %v150_v18 = vpop.xlane.xlu0 %149 }
 0x243   :  { %303 = vrcp.f32 %v150_v18 }
 0x24d   :  { %v304_v19 = vpop.eup %303 }
 0x24e   :  { %v152_v20 = vmul.f32 %v304_v19, %v302_v13 }
 0x250   :  { %282 = vmatmul.mubr.msk.f32.vlgmr.msra.gmra.mrb[0].mxu1 %vm141_vm3, %v152_v20  ;;  %228 = vst.msk [vmem:[#allocation9] sm:$0xff] %vm141_vm3, %v152_v20 }
 0x251   :  { %382 = shalt.err (!%p379_p0)
}
 0x252   :  { %s383_s29 = scalar_lea.hbm %s536_s4, 128 }
 0x253   :  { %p384_p1 = scmp.ne.s32.totalorder %s536_s4, %s383_s29  ;;  %p387_p2 = scmp.lt.u32.totalorder %s383_s29, %s536_s4 }
 0x255   :  { %p389_p3 = pnand %p387_p2, %p384_p1 }
 0x257   :  { %392 = shalt.err (!%p389_p3)
}
 0x258   :  { %249 = dma.vmem_to_hbm [thread:$0]  %s247_s25, 128, %s536_s4, [#allocation10]  }
 0x259   :  { %s432_s10 = smov [#allocation8]  }
 0x25a   :  { %s236_s11 = sshll.u32 %s432_s10, 4  ;;  %s237_s11 = int_to_ptr.vmem [resolvable:$true] %s236_s11 }
 0x25b   :  { %s393_s12 = scalar_lea.vmem %s237_s11, 128  ;;  %p398_p5 = scmp.lt.s32.totalorder %s237_s11, %s237_s11 }
 0x25c   :  { %p394_p4 = scmp.ne.s32.totalorder %s237_s11, %s393_s12  ;;  %p399_p6 = scmp.lt.s32.totalorder %s393_s12, %s393_s12 }
 0x25e   :  { %p400_p7 = por %p399_p6, %p398_p5 }
 0x260   :  { %p401_p8 = pnand %p400_p7, %p394_p4 }
 0x323   :  { %v224_v21 = vpop.f32.mrb[0].mxu1 }
 0x324   :  { %229 = vst.msk [vmem:[#allocation8] sm:$0xff] %vm61_vm1, %v224_v21  ;;  %v283_v22 = vpop.f32.mrb[1].mxu1 }
 0x325   :  { %404 = shalt.err (!%p401_p8)
}
 0x326   :  { %s405_s14 = scalar_lea.hbm %s535_s3, 128 }
 0x327   :  { %p406_p9 = scmp.ne.s32.totalorder %s535_s3, %s405_s14  ;;  %p409_p10 = scmp.lt.u32.totalorder %s405_s14, %s535_s3 }
 0x329   :  { %p411_p11 = pnand %p409_p10, %p406_p9 }
 0x32b   :  { %414 = shalt.err (!%p411_p11)
}
 0x32c   :  { %239 = dma.vmem_to_hbm [thread:$0]  %s237_s11, 128, %s535_s3, [#allocation4]  }
 0x32d   :  { %419 = dma.done.wait [#allocation4], 128  }
 0x32e   :  { %420 = vsyncadd [#allocation4], 4294967168 }
 0x32f   :  { %421 = dma.done.wait [#allocation10], 128  }
 0x330   :  { %422 = vsyncadd [#allocation10], 4294967168 }
 0x331   :  { %256 = vsyncpa [#allocation3], 1 }
 0x332   :  { %257 = vsyncpa [#allocation6], 1 }
 0x333   :  { %258 = vsyncpa [#allocation4], 1 }
 0x334   :  { %259 = vsyncpa [#allocation10], 1 }

// kernel: tpu_custom_call.1
= control target key start
LH: loop header
LB: loop body
LE: loop exit
PB: predicated region body
PF: predicated region fallthrough
CT: control target
= control target key end

     0   :  { %10 = vsyncpa [#allocation3], 0  ;;  %s532_s0 = inlined_call_operand.hbm [shape: f32[8,32], index: 0, kind: input, shape index: {}]   ;;  %s533_s1 = inlined_call_operand.hbm [shape: f32[16,32], index: 1, kind: input, shape index: {}]   ;;  %s534_s2 = inlined_call_operand.hbm [shape: f32[16,32], index: 2, kind: input, shape index: {}]   ;;  %s535_s3 = inlined_call_operand.hbm [shape: f32[8,32], index: 3, kind: output, shape index: {0}]   ;;  %s536_s4 = inlined_call_operand.hbm [shape: f32[8,16], index: 4, kind: output, shape index: {1}]  }
   0x1   :  { %11 = vsyncpa [#allocation6], 0 }
   0x2   :  { %12 = vsyncpa [#allocation4], 0 }
   0x3   :  { %13 = vsyncpa [#allocation10], 0  ;;  %s423_s15 = smov [#allocation5]   ;;  %s305_s19 = scalar_lea.hbm %s533_s1, 256 }
   0x4   :  { %s29_s16 = sshll.u32 %s423_s15, 4  ;;  %p306_p0 = scmp.ne.s32.totalorder %s533_s1, %s305_s19  ;;  %s30_s16 = int_to_ptr.vmem [resolvable:$true] %s29_s16 }
   0x5   :  { %p309_p1 = scmp.lt.u32.totalorder %s305_s19, %s533_s1 }
   0x7   :  { %p311_p2 = pnand %p309_p1, %p306_p0 }
   0x9   :  { %314 = shalt.err (!%p311_p2)
}
   0xa   :  { %s315_s24 = scalar_lea.vmem %s30_s16, 256  ;;  %p320_p4 = scmp.lt.s32.totalorder %s30_s16, %s30_s16 }
   0xb   :  { %p316_p3 = scmp.ne.s32.totalorder %s30_s16, %s315_s24  ;;  %p321_p5 = scmp.lt.s32.totalorder %s315_s24, %s315_s24 }
   0xd   :  { %p322_p6 = por %p321_p5, %p320_p4 }
   0xf   :  { %p323_p7 = pnand %p322_p6, %p316_p3 }
  0x11   :  { %326 = shalt.err (!%p323_p7)
}
  0x12   :  { %s424_s25 = smov 128   ;;  %s425_s26 = smov 8  }
  0x13   :  { %35 = dma.hbm_to_vmem [thread:$0]  %s533_s1, 256, %s30_s16, [#allocation6], %s424_s25, %s424_s25, %s425_s26  }
  0x14   :  { %s426_s29 = smov [#allocation2]   ;;  %s427_s5 = smov [#allocation7]  }
  0x15   :  { %s20_s30 = sshll.u32 %s426_s29, 4  ;;  %s41_s6 = sshll.u32 %s427_s5, 4  ;;  %s21_s30 = int_to_ptr.vmem [resolvable:$true] %s20_s30  ;;  %s42_s6 = int_to_ptr.vmem [resolvable:$true] %s41_s6 }
  0x16   :  { %s327_s9 = scalar_lea.hbm %s532_s0, 128 }
  0x17   :  { %p328_p8 = scmp.ne.s32.totalorder %s532_s0, %s327_s9  ;;  %p331_p9 = scmp.lt.u32.totalorder %s327_s9, %s532_s0 }
  0x19   :  { %p333_p10 = pnand %p331_p9, %p328_p8 }
  0x1b   :  { %336 = shalt.err (!%p333_p10)
}
  0x1c   :  { %s337_s1 = scalar_lea.vmem %s21_s30, 128  ;;  %p342_p12 = scmp.lt.s32.totalorder %s21_s30, %s21_s30 }
  0x1d   :  { %p338_p11 = scmp.ne.s32.totalorder %s21_s30, %s337_s1  ;;  %p343_p13 = scmp.lt.s32.totalorder %s337_s1, %s337_s1 }
  0x1f   :  { %p344_p0 = por %p343_p13, %p342_p12 }
  0x21   :  { %p345_p1 = pnand %p344_p0, %p338_p11 }
  0x23   :  { %348 = shalt.err (!%p345_p1)
}
  0x24   :  { %23 = dma.hbm_to_vmem [thread:$0]  %s532_s0, 128, %s21_s30, [#allocation3]  }
  0x25   :  { %s349_s18 = scalar_lea.hbm %s534_s2, 256 }
  0x26   :  { %p350_p2 = scmp.ne.s32.totalorder %s534_s2, %s349_s18  ;;  %p353_p3 = scmp.lt.u32.totalorder %s349_s18, %s534_s2 }
  0x28   :  { %p355_p4 = pnand %p353_p3, %p350_p2 }
  0x2a   :  { %358 = shalt.err (!%p355_p4)
}
  0x2b   :  { %s359_s23 = scalar_lea.vmem %s42_s6, 256  ;;  %p364_p6 = scmp.lt.s32.totalorder %s42_s6, %s42_s6 }
  0x2c   :  { %p360_p5 = scmp.ne.s32.totalorder %s42_s6, %s359_s23  ;;  %p365_p7 = scmp.lt.s32.totalorder %s359_s23, %s359_s23 }
  0x2e   :  { %p366_p8 = por %p365_p7, %p364_p6 }
  0x30   :  { %p367_p9 = pnand %p366_p8, %p360_p5 }
  0x32   :  { %370 = shalt.err (!%p367_p9)
}
  0x33   :  { %47 = dma.hbm_to_vmem [thread:$0]  %s534_s2, 256, %s42_s6, [#allocation6], %s424_s25, %s424_s25, %s425_s26  }
  0x34   :  { %415 = dma.done.wait [#allocation3], 128  }
  0x35   :  { %416 = vsyncadd [#allocation3], 4294967168 }
  0x36   :  { %417 = dma.done.wait [#allocation6], 512  }
  0x37   :  { %418 = vsyncadd [#allocation6], 4294966784  ;;  %v428_v0 = vmov 0.0|0.0   ;;  %vm429_vm0 = vmmov 0   ;;  %v430_v1 = vmov 0.0   ;;  %vm61_vm1 = vcmask 261120  }
  0x38   :  { %284 = vmatprep.subr.bf16.mxu0 %v428_v0  ;;  %274 = vmatprep.mubr.msk.f32.mxu0 %vm429_vm0, %v430_v1  ;;  %v59_v2 = vld [vmem:[#allocation5] sm:$0xff]  ;;  %v60_v3 = vld [vmem:[#allocation5 + $0x8] sm:$0xff]  ;;  %vm286_vm2 = vmpackc.low %vm61_vm1, %vm61_vm1  ;;  %vm141_vm3 = vcmask 130048   ;;  %s431_s2 = smov [#allocation9]  }
  0x39   :  { %288 = vmatprep.subr.bf16.mxu1 %v428_v0  ;;  %281 = vmatprep.mubr.msk.f32.mxu1 %vm429_vm0, %v430_v1  ;;  %v285_v4 = vpack.c.bf16 %v60_v3, %v59_v2  ;;  %v57_v5 = vld [vmem:[#allocation2] sm:$0xff]  ;;  %v153_v15 = vld [vmem:[#allocation7] sm:$0xff]  ;;  %s246_s25 = sshll.u32 %s431_s2, 4  ;;  %s247_s25 = int_to_ptr.vmem [resolvable:$true] %s246_s25 }
  0x3a   :  { %v58_v6 = vmul.f32 0.17677669, %v57_v5  ;;  %v154_v16 = vld [vmem:[#allocation7 + $0x8] sm:$0xff]  ;;  %s371_s26 = scalar_lea.vmem %s247_s25, 128  ;;  %p376_p11 = scmp.lt.s32.totalorder %s247_s25, %s247_s25 }
  0x3b   :  { %287 = vmatpush3.bf16.xpose.msk.msra.mxu0 %vm286_vm2, %v285_v4  ;;  %v289_v17 = vpack.c.bf16 %v154_v16, %v153_v15  ;;  %p372_p10 = scmp.ne.s32.totalorder %s247_s25, %s371_s26  ;;  %p377_p12 = scmp.lt.s32.totalorder %s371_s26, %s371_s26 }
  0x3d   :  { %290 = vmatpush3.bf16.msra.mxu1 %v289_v17  ;;  %p378_p13 = por %p377_p12, %p376_p11 }
  0x3f   :  { %p379_p0 = pnand %p378_p13, %p372_p10 }
  0x42   :  { %275 = vmatmul.mubr.msk.f32.vlgmr.msra.gmra.mrb[0].mxu0 %vm61_vm1, %v58_v6 }
 0x115   :  { %v137_v7 = vpop.f32.mrb[0].mxu0 }
 0x116   :  { %v276_v8 = vpop.f32.mrb[1].mxu0  ;;  %v142_v9 = vsel %vm141_vm3, %v137_v7, -inf }
 0x117   :  { %143 = vmax.xlane.f32.xlu0 %v142_v9 }
 0x1a4   :  { %v144_v10 = vpop.xlane.xlu0 %143 }
 0x1a5   :  { %v145_v11 = vsub.f32 %v137_v7, %v144_v10 }
 0x1a7   :  { %v146_v12 = vmul.f32 1.442695, %v145_v11 }
 0x1a9   :  { %301 = vpow2.f32 %v146_v12 }
 0x1b3   :  { %v302_v13 = vpop.eup %301 }
 0x1b4   :  { %v148_v14 = vsel %vm141_vm3, %v302_v13, 0.0 }
 0x1b5   :  { %149 = vadd.xlane.f32.xlu0 %v148_v14 }
 0x242   :  { %v150_v18 = vpop.xlane.xlu0 %149 }
 0x243   :  { %303 = vrcp.f32 %v150_v18 }
 0x24d   :  { %v304_v19 = vpop.eup %303 }
 0x24e   :  { %v152_v20 = vmul.f32 %v304_v19, %v302_v13 }
 0x250   :  { %282 = vmatmul.mubr.msk.f32.vlgmr.msra.gmra.mrb[0].mxu1 %vm141_vm3, %v152_v20  ;;  %228 = vst.msk [vmem:[#allocation9] sm:$0xff] %vm141_vm3, %v152_v20 }
 0x251   :  { %382 = shalt.err (!%p379_p0)
}
 0x252   :  { %s383_s29 = scalar_lea.hbm %s536_s4, 128 }
 0x253   :  { %p384_p1 = scmp.ne.s32.totalorder %s536_s4, %s383_s29  ;;  %p387_p2 = scmp.lt.u32.totalorder %s383_s29, %s536_s4 }
 0x255   :  { %p389_p3 = pnand %p387_p2, %p384_p1 }
 0x257   :  { %392 = shalt.err (!%p389_p3)
}
 0x258   :  { %249 = dma.vmem_to_hbm [thread:$0]  %s247_s25, 128, %s536_s4, [#allocation10]  }
 0x259   :  { %s432_s10 = smov [#allocation8]  }
 0x25a   :  { %s236_s11 = sshll.u32 %s432_s10, 4  ;;  %s237_s11 = int_to_ptr.vmem [resolvable:$true] %s236_s11 }
 0x25b   :  { %s393_s12 = scalar_lea.vmem %s237_s11, 128  ;;  %p398_p5 = scmp.lt.s32.totalorder %s237_s11, %s237_s11 }
 0x25c   :  { %p394_p4 = scmp.ne.s32.totalorder %s237_s11, %s393_s12  ;;  %p399_p6 = scmp.lt.s32.totalorder %s393_s12, %s393_s12 }
 0x25e   :  { %p400_p7 = por %p399_p6, %p398_p5 }
 0x260   :  { %p401_p8 = pnand %p400_p7, %p394_p4 }
 0x323   :  { %v224_v21 = vpop.f32.mrb[0].mxu1 }
 0x324   :  { %229 = vst.msk [vmem:[#allocation8] sm:$0xff] %vm61_vm1, %v224_v21  ;;  %v283_v22 = vpop.f32.mrb[1].mxu1 }
 0x325   :  { %404 = shalt.err (!%p401_p8)
}
 0x326   :  { %s405_s14 = scalar_lea.hbm %s535_s3, 128 }
 0x327   :  { %p406_p9 = scmp.ne.s32.totalorder %s535_s3, %s405_s14  ;;  %p409_p10 = scmp.lt.u32.totalorder %s405_s14, %s535_s3 }
 0x329   :  { %p411_p11 = pnand %p409_p10, %p406_p9 }
 0x32b   :  { %414 = shalt.err (!%p411_p11)
}
 0x32c   :  { %239 = dma.vmem_to_hbm [thread:$0]  %s237_s11, 128, %s535_s3, [#allocation4]  }
 0x32d   :  { %419 = dma.done.wait [#allocation4], 128  }
 0x32e   :  { %420 = vsyncadd [#allocation4], 4294967168 }
 0x32f   :  { %421 = dma.done.wait [#allocation10], 128  }
 0x330   :  { %422 = vsyncadd [#allocation10], 4294967168 }
 0x331   :  { %256 = vsyncpa [#allocation3], 1 }
 0x332   :  { %257 = vsyncpa [#allocation6], 1 }
 0x333   :  { %258 = vsyncpa [#allocation4], 1 }
 0x334   :  { %259 = vsyncpa [#allocation10], 1 }

</bundles_post_ra>
